<compile_context>
chip_gen: v5e
topology: v5e:2x2
jax: 0.10.0
libtpu: 0.0.40
codegen_flags: <defaults>
</compile_context>

<pallas_src>
import numpy as np
import jax
import jax.numpy as jnp
from jax.experimental import pallas as pl
from jax.experimental.pallas import tpu as pltpu


# ----------------------------------------------------------------------------
# Kernel: one MXU matmul per row-block.  out[r, k] = x[r, src(k)] via a 0/1 matrix.
# ----------------------------------------------------------------------------
def _upsample_kernel(x_ref, t_ref, o_ref):
    o_ref[...] = jnp.dot(
        x_ref[...], t_ref[...], preferred_element_type=jnp.float32
    ).astype(o_ref.dtype)


def _pick_row_block(rows, row_bytes, budget_bytes=2 * 1024 * 1024):
    """Largest power-of-two row block (multiple of 8) dividing `rows` within a VMEM budget."""
    for cand in (4096, 2048, 1024, 512, 256, 128, 64, 32, 16, 8):
        if rows % cand == 0 and cand * row_bytes <= budget_bytes:
            return cand
    return rows  # small / odd row counts: single block (block dim == full dim is allowed)


# ----------------------------------------------------------------------------
# Wrapper: nearest-neighbour upsample by integer scale on an NCHW tensor.
# ----------------------------------------------------------------------------
def pallas_upsample_nearest(x, scale_factor=2):
    s = int(scale_factor)
    if s < 1:
        raise ValueError("scale_factor must be a positive integer")
    N, C, H, W = x.shape
    dtype = x.dtype
    s2w = s * s * W                       # output elements produced per input image row

    # Pack P consecutive image rows per kernel row so the output row is >= 128 lanes.
    # P must divide H so packed rows never straddle an (n, c) image boundary, which is
    # what keeps every reshape below a free row-major reinterpretation.
    P = 1
    while P * s2w < 128 and H % (2 * P) == 0:
        P *= 2

    rows = (N * C * H) // P               # kernel rows
    in_w = P * W                          # kernel input row width
    out_w = P * s2w                       # kernel output row width (NCHW-contiguous)

    # 0/1 selection matrix T (in_w, out_w):
    #   output column k = p*s*s*W + di*s*W + s*j + dj  reads input column  p*W + j
    k = jnp.arange(out_w)
    src = (k // s2w) * W + (k % (s * W)) // s
    t = (src[None, :] == jnp.arange(in_w)[:, None]).astype(dtype)

    x2 = x.reshape(rows, in_w)            # free reshape of the NCHW layout

    tr = _pick_row_block(rows, out_w * x.dtype.itemsize)
    grid = (rows // tr,)

    out = pl.pallas_call(
        _upsample_kernel,
        out_shape=jax.ShapeDtypeStruct((rows, out_w), dtype),
        grid_spec=pltpu.PrefetchScalarGridSpec(
            num_scalar_prefetch=0,
            grid=grid,
            in_specs=[
                pl.BlockSpec((tr, in_w), lambda i: (i, 0)),
                pl.BlockSpec((in_w, out_w), lambda i: (0, 0)),   # resident selection matrix
            ],
            out_specs=pl.BlockSpec((tr, out_w), lambda i: (i, 0)),
        ),
        compiler_params=pltpu.CompilerParams(
            dimension_semantics=("parallel",),
        ),
    )(x2, t)

    return out.reshape(N, C, s * H, s * W)  # free reshape back to NCHW


def upsample_forward(x, size=None, scale_factor=2, mode="nearest"):
    """Equivalent of Upsample.forward for NCHW inputs."""
    if mode != "nearest":
        # TODO(synk): 'bilinear' / 'bicubic' interpolation modes are not implemented here.
        raise NotImplementedError("only mode='nearest' is implemented")
    if size is not None:
        # TODO(synk): explicit `size=` (arbitrary output size) is not implemented; only
        #             integer scale_factor nearest-neighbour upsampling is supported.
        raise NotImplementedError("only scale_factor-based upsampling is implemented")
    return pallas_upsample_nearest(x, scale_factor)


# ----------------------------------------------------------------------------
# Pure-JAX reference (matches torch.nn.Upsample(scale_factor=s, mode='nearest'))
# ----------------------------------------------------------------------------
def upsample_nearest_ref(x, s):
    return jnp.repeat(jnp.repeat(x, s, axis=2), s, axis=3)


if __name__ == "__main__":
    key = jax.random.PRNGKey(0)
    N, C, H, W = 2, 4, 16, 16             # PyTorch-style NCHW input
    scale = 2

    x = jax.random.normal(key, (N, C, H, W), jnp.float32)
    # Test values are rounded to bf16-representable f32 so the check below is bit-exact
    # regardless of how many bf16 passes the MXU uses for the f32 matmul (the selection
    # matrix is 0/1, so every output element is a single 1.0 * x product in f32).
    x = x.astype(jnp.bfloat16).astype(jnp.float32)

    out = upsample_forward(x, scale_factor=scale, mode="nearest")
    out = jax.block_until_ready(out)

    ref = upsample_nearest_ref(x, scale)
    assert out.shape == (N, C, scale * H, scale * W), out.shape
    np.testing.assert_allclose(np.asarray(out), np.asarray(ref), rtol=1e-6, atol=1e-6)
    print("KERNEL_OK")
</pallas_src>

<mosaic_0001>
module attributes {stable_mosaic.version = 11 : i64} {
  func.func @_upsample_kernel(%arg0: i32, %arg1: memref<64x32xf32, #tpu.memory_space<vmem>>, %arg2: memref<32x128xf32, #tpu.memory_space<vmem>>, %arg3: memref<64x128xf32, #tpu.memory_space<vmem>>) attributes {dimension_semantics = [#tpu.dimension_semantics<parallel>], iteration_bounds = array<i64: 1>, scalar_prefetch = 0 : i64, scratch_operands = 0 : i64, tpu.core_type = #tpu.core_type<tc>, window_params = [{transform_indices = @transform_0, window_bounds = array<i64: 64, 32>}, {pipeline_mode = #tpu.pipeline_mode<synchronous>, transform_indices = @transform_1, window_bounds = array<i64: 32, 128>}, {transform_indices = @transform_2, window_bounds = array<i64: 64, 128>}]} {
    %c0 = arith.constant 0 : index
    %c0_0 = arith.constant 0 : index
    %0 = vector.load %arg1[%c0, %c0_0] : memref<64x32xf32, #tpu.memory_space<vmem>>, vector<64x32xf32>
    %c0_1 = arith.constant 0 : index
    %c0_2 = arith.constant 0 : index
    %1 = vector.load %arg2[%c0_1, %c0_2] : memref<32x128xf32, #tpu.memory_space<vmem>>, vector<32x128xf32>
    %cst = arith.constant dense<0.000000e+00> : vector<64x128xf32>
    %2 = tpu.matmul %0, %1, %cst {dimension_numbers = #tpu.dot_dimension_numbers<[1], [0], [0], [1], [0, 0, 1, 1], [], []>} : vector<64x32xf32>, vector<32x128xf32>, vector<64x128xf32> -> vector<64x128xf32>
    %c0_3 = arith.constant 0 : index
    %c0_4 = arith.constant 0 : index
    %3 = vector.load %arg3[%c0_3, %c0_4] : memref<64x128xf32, #tpu.memory_space<vmem>>, vector<64x128xf32>
    tpu.vector_store %arg3[%c0_3, %c0_4], %2 {strides = array<i32>} : memref<64x128xf32, #tpu.memory_space<vmem>>, vector<64x128xf32>,
    return
  }
  func.func @transform_0(%arg0: i32) -> (i32, i32) {
    %c0_i32 = arith.constant 0 : i32
    %c0_i32_0 = arith.constant 0 : i32
    return %arg0, %c0_i32 : i32, i32
  }
  func.func @transform_1(%arg0: i32) -> (i32, i32) {
    %c0_i32 = arith.constant 0 : i32
    %c0_i32_0 = arith.constant 0 : i32
    %c0_i32_1 = arith.constant 0 : i32
    return %c0_i32, %c0_i32_0 : i32, i32
  }
  func.func @transform_2(%arg0: i32) -> (i32, i32) {
    %c0_i32 = arith.constant 0 : i32
    %c0_i32_0 = arith.constant 0 : i32
    return %arg0, %c0_i32 : i32, i32
  }
}

</mosaic_0001>

<bundles_post_ra>
// kernel: tpu_custom_call.1
= control target key start
LH: loop header
LB: loop body
LE: loop exit
PB: predicated region body
PF: predicated region fallthrough
CT: control target
= control target key end

     0   :  { %s230_s0 = inlined_call_operand.vmem [shape: f32[64,32], index: 0, kind: input, shape index: {}]   ;;  %s231_s1 = inlined_call_operand.vmem [shape: f32[32,128], index: 1, kind: input, shape index: {}]   ;;  %s232_s2 = inlined_call_operand.hbm [shape: f32[64,128], index: 2, kind: output, shape index: {}]  }
   0x1   :  { %v23_v0 = vld [vmem:[%s231_s1 + $0x18] sm:$0xff]  ;;  %v22_v1 = vld [vmem:[%s231_s1 + $0x10] sm:$0xff]  ;;  %v21_v2 = vld [vmem:[%s231_s1 + $0x8] sm:$0xff] }
   0x2   :  { %125 = vmatpush.msra.mxu2 %v23_v0  ;;  %126 = vmatpush.msra.mxu3 %v23_v0  ;;  %v20_v3 = vld [vmem:[%s231_s1] sm:$0xff] }
   0x3   :  { %61 = vmatpush.msra.mxu0 %v23_v0  ;;  %124 = vmatpush.msra.mxu1 %v23_v0 }
   0x4   :  { %128 = vmatpush.msra.mxu2 %v22_v1  ;;  %129 = vmatpush.msra.mxu3 %v22_v1 }
   0x5   :  { %62 = vmatpush.msra.mxu0 %v22_v1  ;;  %127 = vmatpush.msra.mxu1 %v22_v1 }
   0x6   :  { %7 = vsyncpa [#allocation3], 0  ;;  %131 = vmatpush.msra.mxu2 %v21_v2  ;;  %132 = vmatpush.msra.mxu3 %v21_v2  ;;  %v16_v4 = vld [vmem:[%s230_s0 + $0x20] sm:$0xff]  ;;  %vm24_vm0 = vcmask 261120   ;;  %v18_v5 = vld [vmem:[%s230_s0 + $0x30] sm:$0xff]  ;;  %s165_s4 = smov [#allocation2]  }
   0x7   :  { %63 = vmatpush.msra.mxu0 %v21_v2  ;;  %130 = vmatpush.msra.mxu1 %v21_v2  ;;  %v12_v6 = vld [vmem:[%s230_s0] sm:$0xff]  ;;  %v14_v7 = vld [vmem:[%s230_s0 + $0x10] sm:$0xff]  ;;  %v17_v8 = vld [vmem:[%s230_s0 + $0x28] sm:$0xff]  ;;  %s104_s7 = sshll.u32 %s232_s2, 4  ;;  %s166_s8 = smov 128   ;;  %s105_s7 = int_to_ptr.hbm [resolvable:$true] %s104_s7 }
   0x8   :  { %134 = vmatpush.msra.mxu2 %v20_v3  ;;  %135 = vmatpush.msra.mxu3 %v20_v3  ;;  %v19_v9 = vld [vmem:[%s230_s0 + $0x38] sm:$0xff]  ;;  %v13_v10 = vld [vmem:[%s230_s0 + $0x8] sm:$0xff]  ;;  %s167_s9 = smov 8  }
   0x9   :  { %120 = vmatmul.msk.f32.vlgmr.msra.gmra.mxu2 %vm24_vm0, %v16_v4  ;;  %122 = vmatmul.msk.f32.vlgmr.msra.gmra.mxu3 %vm24_vm0, %v18_v5  ;;  %v15_v11 = vld [vmem:[%s230_s0 + $0x18] sm:$0xff]  ;;  %s102_s0 = sshll.u32 %s165_s4, 4  ;;  %s103_s0 = int_to_ptr.vmem [resolvable:$true] %s102_s0 }
   0xa   :  { %64 = vmatpush.msra.mxu0 %v20_v3  ;;  %133 = vmatpush.msra.mxu1 %v20_v3 }
   0xb   :  { %116 = vmatmul.msk.f32.vlgmr.msra.gmra.mxu0 %vm24_vm0, %v12_v6  ;;  %118 = vmatmul.msk.f32.vlgmr.msra.gmra.mxu1 %vm24_vm0, %v14_v7 }
  0x11   :  { %121 = vmatmul.msk.f32.gmra.mxu2 %vm24_vm0, %v17_v8  ;;  %123 = vmatmul.msk.f32.gmra.mxu3 %vm24_vm0, %v19_v9 }
  0x13   :  { %117 = vmatmul.msk.f32.gmra.mxu0 %vm24_vm0, %v13_v10  ;;  %119 = vmatmul.msk.f32.gmra.mxu1 %vm24_vm0, %v15_v11 }
  0x88   :  { %v66_v12 = vpop.f32.mrf.mxu0  ;;  %v72_v13 = vpop.f32.mrf.mxu1 }
  0x89   :  { %90 = vst [vmem:[#allocation2] sm:$0xff] %v66_v12 }
  0x8a   :  { %92 = vst [vmem:[#allocation2 + $0x10] sm:$0xff] %v72_v13 }
  0x8c   :  { %v78_v14 = vpop.f32.mrf.mxu2  ;;  %v84_v15 = vpop.f32.mrf.mxu3 }
  0x8d   :  { %94 = vst [vmem:[#allocation2 + $0x20] sm:$0xff] %v78_v14 }
  0x8e   :  { %96 = vst [vmem:[#allocation2 + $0x30] sm:$0xff] %v84_v15 }
  0x90   :  { %v69_v16 = vpop.f32.mrf.mxu0  ;;  %v75_v17 = vpop.f32.mrf.mxu1 }
  0x91   :  { %91 = vst [vmem:[#allocation2 + $0x8] sm:$0xff] %v69_v16 }
  0x92   :  { %93 = vst [vmem:[#allocation2 + $0x18] sm:$0xff] %v75_v17 }
  0x94   :  { %v81_v18 = vpop.f32.mrf.mxu2  ;;  %v87_v19 = vpop.f32.mrf.mxu3 }
  0x95   :  { %95 = vst [vmem:[#allocation2 + $0x28] sm:$0xff] %v81_v18 }
  0x96   :  { %97 = vst [vmem:[#allocation2 + $0x38] sm:$0xff] %v87_v19 }
  0x97   :  { %110 = dma.vmem_to_hbm [thread:$0]  %s103_s0, 1024, %s105_s7, [#allocation3], %s166_s8, %s166_s8, %s167_s9  }
  0x98   :  { %163 = dma.done.wait [#allocation3], 1024  }
  0x99   :  { %164 = vsyncadd [#allocation3], 4294966272 }
  0x9a   :  { %115 = vsyncpa [#allocation3], 1 }

</bundles_post_ra>
